<compile_context>
chip_gen: v5e
topology: v5e:2x2
jax: 0.10.0
libtpu: 0.0.40
codegen_flags: <defaults>
</compile_context>

<pallas_src>
import jax
import jax.numpy as jnp
from jax.experimental import pallas as pl
from jax.experimental.pallas import tpu as pltpu


def _round_up(x, m):
    return ((x + m - 1) // m) * m


def _cdiv(a, b):
    return (a + b - 1) // b


# Resident-weight path is used while the bf16 weights (single-buffered) fit in
# this many bytes; beyond it we stream W1/W2 over hidden-dim tiles (keeps the
# kernel inside v7x's 64 MiB VMEM, avoids spill on v5e/v6e's 128 MiB).
_RESIDENT_WEIGHT_LIMIT = 16 * 1024 * 1024


def _spec(shape, index_map, pipeline_mode=None):
    if pipeline_mode is None:
        return pl.BlockSpec(shape, index_map)
    return pl.BlockSpec(shape, index_map, pipeline_mode=pipeline_mode)


def _pad_cast_2d(a, shape, dtype):
    """Zero-pad a 2-D array up to `shape` and cast; skips no-op passes."""
    a = a.astype(dtype)
    if a.shape == shape:
        return a
    return jnp.zeros(shape, dtype).at[:a.shape[0], :a.shape[1]].set(a)


# ----------------------------- kernels -------------------------------------


def _critic_resident_kernel(x_ref, w1_ref, b1_ref, w2_ref, b2_ref, o_ref):
    # hidden = relu(x @ W1 + b1): bf16 MXU operands, f32 accumulate;
    # bias add + ReLU stay f32 on the VPU.
    h = jnp.dot(x_ref[...], w1_ref[...], preferred_element_type=jnp.float32)
    h = jnp.maximum(h + b1_ref[...], 0.0)
    # out = hidden @ W2 + b2
    y = jnp.dot(h.astype(jnp.bfloat16), w2_ref[...],
                preferred_element_type=jnp.float32)
    o_ref[...] = (y + b2_ref[...]).astype(o_ref.dtype)


def _critic_htiled_kernel(x_ref, w1_ref, b1_ref, w2_ref, b2_ref, o_ref, acc_ref):
    # Streaming fallback: grid = (batch_tiles, hidden_tiles); GEMM2 contraction
    # over hidden is accumulated in an f32 VMEM scratch (P3 pattern).
    h_idx = pl.program_id(1)

    @pl.when(h_idx == 0)
    def _():
        acc_ref[...] = jnp.zeros_like(acc_ref)

    h = jnp.dot(x_ref[...], w1_ref[...], preferred_element_type=jnp.float32)
    h = jnp.maximum(h + b1_ref[...], 0.0)
    acc_ref[...] += jnp.dot(h.astype(jnp.bfloat16), w2_ref[...],
                            preferred_element_type=jnp.float32)

    @pl.when(h_idx == pl.num_programs(1) - 1)
    def _():
        o_ref[...] = (acc_ref[...] + b2_ref[...]).astype(o_ref.dtype)


# ----------------------------- wrapper --------------------------------------


def critic_forward(x, w1, b1, w2, b2, *, block_batch=1024, h_tile=512,
                   force_htiled=False):
    """x: (B, in) f32; w1: (in, hidden); b1: (hidden,); w2: (hidden, out);
    b2: (out,). Returns (B, out) f32.

    For repeated calls wrap in
      jax.jit(critic_forward, static_argnames=("block_batch","h_tile","force_htiled"))
    so the pad/cast preprocessing fuses and the weight prep hoists across steps.
    """
    B, K = x.shape
    H = w1.shape[1]
    O = w2.shape[1]

    # Batch tile: multiple of 16 (bf16 sublane packing); keep >= 2 grid steps
    # so the "parallel" axis can use both v7x TensorCores.
    TB = min(_round_up(block_batch, 16), _round_up(B, 16))
    if _round_up(B, TB) // TB < 2 and B > 16:
        TB = _round_up(_cdiv(B, 2), 16)
    Bp = _round_up(B, TB)
    num_b = Bp // TB

    # x goes to the kernel as bf16 (halves the dominant HBM stream); the pad
    # copy is a no-op when B already divides the tile.
    xp = _pad_cast_2d(x, (Bp, K), jnp.bfloat16)

    Hp_res = _round_up(H, 128)
    resident_bytes = (K * Hp_res + Hp_res * O) * 2  # bf16 weights, 1 buffer
    use_resident = (not force_htiled) and resident_bytes <= _RESIDENT_WEIGHT_LIMIT

    if use_resident:
        Hp = Hp_res
        w1p = _pad_cast_2d(w1, (K, Hp), jnp.bfloat16)
        b1p = _pad_cast_2d(b1.reshape(1, H), (1, Hp), jnp.float32)
        w2p = _pad_cast_2d(w2, (Hp, O), jnp.bfloat16)   # no 128-padding of tiny O
        b2p = b2.reshape(1, O).astype(jnp.float32)

        # VMEM budget: weights (allow 2x in case single-buffering is not
        # available) + double-buffered x/out tiles + headroom; clamp to
        # [16 MiB, 48 MiB] so it fits inside v7x's 64 MiB physical VMEM.
        need = (2 * resident_bytes + (Hp + O) * 4 * 2
                + 2 * TB * K * 2 + 2 * TB * O * 4)
        vmem_bytes = int(min(max(need + (4 << 20), 16 << 20), 48 << 20))

        def run(weight_mode):
            grid_spec = pltpu.PrefetchScalarGridSpec(
                num_scalar_prefetch=0,
                grid=(num_b,),
                in_specs=[
                    pl.BlockSpec((TB, K), lambda i: (i, 0)),        # x marches over batch
                    _spec((K, Hp), lambda i: (0, 0), weight_mode),  # W1 resident
                    _spec((1, Hp), lambda i: (0, 0), weight_mode),  # b1 resident
                    _spec((Hp, O), lambda i: (0, 0), weight_mode),  # W2 resident
                    _spec((1, O), lambda i: (0, 0), weight_mode),   # b2 resident
                ],
                out_specs=pl.BlockSpec((TB, O), lambda i: (i, 0)),
            )
            out = pl.pallas_call(
                _critic_resident_kernel,
                out_shape=jax.ShapeDtypeStruct((Bp, O), jnp.float32),
                grid_spec=grid_spec,
                compiler_params=pltpu.CompilerParams(
                    dimension_semantics=("parallel",),
                    vmem_limit_bytes=vmem_bytes,
                ),
            )(xp, w1p, b1p, w2p, b2p)
            return jax.block_until_ready(out)

        try:
            out = run(pl.Buffered(1))       # single-buffer the resident weights
        except Exception:                   # pipeline_mode unsupported -> default
            out = run(None)
        return out[:B]

    # ---- H-tiled streaming fallback (weights too large to sit in VMEM) ----
    TH = min(_round_up(h_tile, 128), _round_up(H, 128))
    Hp = _round_up(H, TH)
    num_h = Hp // TH

    w1p = _pad_cast_2d(w1, (K, Hp), jnp.bfloat16)
    b1p = _pad_cast_2d(b1.reshape(1, H), (1, Hp), jnp.float32)
    w2p = _pad_cast_2d(w2, (Hp, O), jnp.bfloat16)
    b2p = b2.reshape(1, O).astype(jnp.float32)

    need = (2 * (K * TH + TH * O) * 2 + 2 * TH * 4 + 2 * O * 4
            + 2 * TB * K * 2 + 2 * TB * O * 4 + TB * O * 4)
    vmem_bytes = int(min(max(need + (4 << 20), 16 << 20), 48 << 20))

    def run_tiled(const_mode):
        grid_spec = pltpu.PrefetchScalarGridSpec(
            num_scalar_prefetch=0,
            grid=(num_b, num_h),
            in_specs=[
                pl.BlockSpec((TB, K), lambda i, h: (i, 0)),      # x held per batch tile
                pl.BlockSpec((K, TH), lambda i, h: (0, h)),      # W1 streamed over hidden
                pl.BlockSpec((1, TH), lambda i, h: (0, h)),      # b1 streamed
                pl.BlockSpec((TH, O), lambda i, h: (h, 0)),      # W2 streamed
                _spec((1, O), lambda i, h: (0, 0), const_mode),  # b2 resident
            ],
            out_specs=pl.BlockSpec((TB, O), lambda i, h: (i, 0)),
            scratch_shapes=[pltpu.VMEM((TB, O), jnp.float32)],
        )
        out = pl.pallas_call(
            _critic_htiled_kernel,
            out_shape=jax.ShapeDtypeStruct((Bp, O), jnp.float32),
            grid_spec=grid_spec,
            compiler_params=pltpu.CompilerParams(
                dimension_semantics=("parallel", "arbitrary"),
                vmem_limit_bytes=vmem_bytes,
            ),
        )(xp, w1p, b1p, w2p, b2p)
        return jax.block_until_ready(out)

    try:
        out = run_tiled(pl.Buffered(1))
    except Exception:
        out = run_tiled(None)
    return out[:B]


# ----------------------------- init / reference -----------------------------


def init_critic_params(key, input_size, hidden_size, output_size):
    """Deterministic init mimicking nn.Linear's U(-1/sqrt(fan_in), 1/sqrt(fan_in))."""
    k1, k2, k3, k4 = jax.random.split(key, 4)
    bound1 = 1.0 / jnp.sqrt(input_size)
    bound2 = 1.0 / jnp.sqrt(hidden_size)
    # Stored as (in, out) so the kernel computes x @ W (torch stores (out, in)).
    w1 = jax.random.uniform(k1, (input_size, hidden_size), jnp.float32,
                            -bound1, bound1)
    b1 = jax.random.uniform(k2, (hidden_size,), jnp.float32, -bound1, bound1)
    w2 = jax.random.uniform(k3, (hidden_size, output_size), jnp.float32,
                            -bound2, bound2)
    b2 = jax.random.uniform(k4, (output_size,), jnp.float32, -bound2, bound2)
    return w1, b1, w2, b2


def _matched_ref(x, w1, b1, w2, b2):
    """Plain-JAX reference with identical bf16-operand / f32-accumulate math."""
    h = jnp.dot(x.astype(jnp.bfloat16), w1.astype(jnp.bfloat16),
                preferred_element_type=jnp.float32)
    h = jnp.maximum(h + b1.reshape(1, -1), 0.0)
    y = jnp.dot(h.astype(jnp.bfloat16), w2.astype(jnp.bfloat16),
                preferred_element_type=jnp.float32)
    return y + b2.reshape(1, -1)


if __name__ == "__main__":
    key = jax.random.PRNGKey(0)
    kx, kp = jax.random.split(key)

    # --- Test 1: resident-weights path, multi-step "parallel" batch grid
    #     (B=40 with TB=16 -> 3 steps, batch padding exercised). ---
    B, K, H, O = 40, 32, 64, 8
    x = jax.random.normal(kx, (B, K), jnp.float32)
    w1, b1, w2, b2 = init_critic_params(kp, K, H, O)

    y = critic_forward(x, w1, b1, w2, b2, block_batch=16)
    jax.block_until_ready(y)
    assert y.shape == (B, O)

    # Tight check vs. a reference using the same bf16/f32 math.
    ref_bf16 = _matched_ref(x, w1, b1, w2, b2)
    assert jnp.allclose(y, ref_bf16, atol=1e-3, rtol=1e-3)
    # Loose check vs. the pure-f32 PyTorch-equivalent forward.
    ref_f32 = jnp.maximum(x @ w1 + b1, 0.0) @ w2 + b2
    assert jnp.allclose(y, ref_f32, atol=5e-2, rtol=5e-2)

    # --- Test 2: H-tiled streaming fallback (2 hidden tiles -> accumulation
    #     over the "arbitrary" axis exercised). ---
    B2, K2, H2, O2 = 24, 32, 192, 4
    x2 = jax.random.normal(jax.random.fold_in(kx, 1), (B2, K2), jnp.float32)
    p2 = init_critic_params(jax.random.fold_in(kp, 1), K2, H2, O2)

    y2 = critic_forward(x2, *p2, block_batch=16, h_tile=128, force_htiled=True)
    jax.block_until_ready(y2)
    assert y2.shape == (B2, O2)
    ref2 = _matched_ref(x2, *p2)
    assert jnp.allclose(y2, ref2, atol=1e-3, rtol=1e-3)

    print("KERNEL_OK")
</pallas_src>

<mosaic_0001>
module attributes {stable_mosaic.version = 11 : i64} {
  func.func @_critic_resident_kernel(%arg0: i32, %arg1: memref<16x32xbf16, #tpu.memory_space<vmem>>, %arg2: memref<32x128xbf16, #tpu.memory_space<vmem>>, %arg3: memref<1x128xf32, #tpu.memory_space<vmem>>, %arg4: memref<128x8xbf16, #tpu.memory_space<vmem>>, %arg5: memref<1x8xf32, #tpu.memory_space<vmem>>, %arg6: memref<16x8xf32, #tpu.memory_space<vmem>>) attributes {dimension_semantics = [#tpu.dimension_semantics<parallel>], iteration_bounds = array<i64: 3>, scalar_prefetch = 0 : i64, scratch_operands = 0 : i64, tpu.core_type = #tpu.core_type<tc>, window_params = [{transform_indices = @transform_0, window_bounds = array<i64: 16, 32>}, {pipeline_mode = #tpu.pipeline_mode<synchronous>, transform_indices = @transform_1, window_bounds = array<i64: 32, 128>}, {pipeline_mode = #tpu.pipeline_mode<synchronous>, transform_indices = @transform_2, window_bounds = array<i64: 1, 128>}, {pipeline_mode = #tpu.pipeline_mode<synchronous>, transform_indices = @transform_3, window_bounds = array<i64: 128, 8>}, {pipeline_mode = #tpu.pipeline_mode<synchronous>, transform_indices = @transform_4, window_bounds = array<i64: 1, 8>}, {transform_indices = @transform_5, window_bounds = array<i64: 16, 8>}]} {
    %c0 = arith.constant 0 : index
    %c0_0 = arith.constant 0 : index
    %0 = vector.load %arg1[%c0, %c0_0] : memref<16x32xbf16, #tpu.memory_space<vmem>>, vector<16x32xbf16>
    %c0_1 = arith.constant 0 : index
    %c0_2 = arith.constant 0 : index
    %1 = vector.load %arg2[%c0_1, %c0_2] : memref<32x128xbf16, #tpu.memory_space<vmem>>, vector<32x128xbf16>
    %cst = arith.constant dense<0.000000e+00> : vector<16x128xf32>
    %2 = tpu.matmul %0, %1, %cst {dimension_numbers = #tpu.dot_dimension_numbers<[1], [0], [0], [1], [0, 0, 1, 1], [], []>} : vector<16x32xbf16>, vector<32x128xbf16>, vector<16x128xf32> -> vector<16x128xf32>
    %c0_3 = arith.constant 0 : index
    %c0_4 = arith.constant 0 : index
    %3 = vector.load %arg3[%c0_3, %c0_4] : memref<1x128xf32, #tpu.memory_space<vmem>>, vector<1x128xf32>
    %4 = vector.broadcast %3 : vector<1x128xf32> to vector<16x128xf32>
    %5 = arith.addf %2, %4 : vector<16x128xf32>
    %cst_5 = arith.constant 0.000000e+00 : f32
    %6 = vector.broadcast %cst_5 : f32 to vector<16x128xf32>
    %7 = arith.maximumf %5, %6 : vector<16x128xf32>
    %8 = arith.truncf %7 : vector<16x128xf32> to vector<16x128xbf16>
    %c0_6 = arith.constant 0 : index
    %c0_7 = arith.constant 0 : index
    %9 = vector.load %arg4[%c0_6, %c0_7] : memref<128x8xbf16, #tpu.memory_space<vmem>>, vector<128x8xbf16>
    %cst_8 = arith.constant dense<0.000000e+00> : vector<16x8xf32>
    %10 = tpu.matmul %8, %9, %cst_8 {dimension_numbers = #tpu.dot_dimension_numbers<[1], [0], [0], [1], [0, 0, 1, 1], [], []>} : vector<16x128xbf16>, vector<128x8xbf16>, vector<16x8xf32> -> vector<16x8xf32>
    %c0_9 = arith.constant 0 : index
    %c0_10 = arith.constant 0 : index
    %11 = vector.load %arg5[%c0_9, %c0_10] : memref<1x8xf32, #tpu.memory_space<vmem>>, vector<1x8xf32>
    %12 = vector.broadcast %11 : vector<1x8xf32> to vector<16x8xf32>
    %13 = arith.addf %10, %12 : vector<16x8xf32>
    %c0_11 = arith.constant 0 : index
    %c0_12 = arith.constant 0 : index
    %14 = vector.load %arg6[%c0_11, %c0_12] : memref<16x8xf32, #tpu.memory_space<vmem>>, vector<16x8xf32>
    tpu.vector_store %arg6[%c0_11, %c0_12], %13 {strides = array<i32>} : memref<16x8xf32, #tpu.memory_space<vmem>>, vector<16x8xf32>,
    return
  }
  func.func @transform_0(%arg0: i32) -> (i32, i32) {
    %c0_i32 = arith.constant 0 : i32
    %c0_i32_0 = arith.constant 0 : i32
    return %arg0, %c0_i32 : i32, i32
  }
  func.func @transform_1(%arg0: i32) -> (i32, i32) {
    %c0_i32 = arith.constant 0 : i32
    %c0_i32_0 = arith.constant 0 : i32
    %c0_i32_1 = arith.constant 0 : i32
    return %c0_i32, %c0_i32_0 : i32, i32
  }
  func.func @transform_2(%arg0: i32) -> (i32, i32) {
    %c0_i32 = arith.constant 0 : i32
    %c0_i32_0 = arith.constant 0 : i32
    %c0_i32_1 = arith.constant 0 : i32
    return %c0_i32, %c0_i32_0 : i32, i32
  }
  func.func @transform_3(%arg0: i32) -> (i32, i32) {
    %c0_i32 = arith.constant 0 : i32
    %c0_i32_0 = arith.constant 0 : i32
    %c0_i32_1 = arith.constant 0 : i32
    return %c0_i32, %c0_i32_0 : i32, i32
  }
  func.func @transform_4(%arg0: i32) -> (i32, i32) {
    %c0_i32 = arith.constant 0 : i32
    %c0_i32_0 = arith.constant 0 : i32
    %c0_i32_1 = arith.constant 0 : i32
    return %c0_i32, %c0_i32_0 : i32, i32
  }
  func.func @transform_5(%arg0: i32) -> (i32, i32) {
    %c0_i32 = arith.constant 0 : i32
    %c0_i32_0 = arith.constant 0 : i32
    return %arg0, %c0_i32 : i32, i32
  }
}

module attributes {stable_mosaic.version = 11 : i64} {
  func.func @_critic_resident_kernel(%arg0: i32, %arg1: memref<16x32xbf16, #tpu.memory_space<vmem>>, %arg2: memref<32x128xbf16, #tpu.memory_space<vmem>>, %arg3: memref<1x128xf32, #tpu.memory_space<vmem>>, %arg4: memref<128x8xbf16, #tpu.memory_space<vmem>>, %arg5: memref<1x8xf32, #tpu.memory_space<vmem>>, %arg6: memref<16x8xf32, #tpu.memory_space<vmem>>) attributes {dimension_semantics = [#tpu.dimension_semantics<parallel>], iteration_bounds = array<i64: 3>, scalar_prefetch = 0 : i64, scratch_operands = 0 : i64, tpu.core_type = #tpu.core_type<tc>, window_params = [{transform_indices = @transform_0, window_bounds = array<i64: 16, 32>}, {pipeline_mode = #tpu.pipeline_mode<synchronous>, transform_indices = @transform_1, window_bounds = array<i64: 32, 128>}, {pipeline_mode = #tpu.pipeline_mode<synchronous>, transform_indices = @transform_2, window_bounds = array<i64: 1, 128>}, {pipeline_mode = #tpu.pipeline_mode<synchronous>, transform_indices = @transform_3, window_bounds = array<i64: 128, 8>}, {pipeline_mode = #tpu.pipeline_mode<synchronous>, transform_indices = @transform_4, window_bounds = array<i64: 1, 8>}, {transform_indices = @transform_5, window_bounds = array<i64: 16, 8>}]} {
    %c0 = arith.constant 0 : index
    %c0_0 = arith.constant 0 : index
    %0 = vector.load %arg1[%c0, %c0_0] : memref<16x32xbf16, #tpu.memory_space<vmem>>, vector<16x32xbf16>
    %c0_1 = arith.constant 0 : index
    %c0_2 = arith.constant 0 : index
    %1 = vector.load %arg2[%c0_1, %c0_2] : memref<32x128xbf16, #tpu.memory_space<vmem>>, vector<32x128xbf16>
    %cst = arith.constant dense<0.000000e+00> : vector<16x128xf32>
    %2 = tpu.matmul %0, %1, %cst {dimension_numbers = #tpu.dot_dimension_numbers<[1], [0], [0], [1], [0, 0, 1, 1], [], []>} : vector<16x32xbf16>, vector<32x128xbf16>, vector<16x128xf32> -> vector<16x128xf32>
    %c0_3 = arith.constant 0 : index
    %c0_4 = arith.constant 0 : index
    %3 = vector.load %arg3[%c0_3, %c0_4] : memref<1x128xf32, #tpu.memory_space<vmem>>, vector<1x128xf32>
    %4 = vector.broadcast %3 : vector<1x128xf32> to vector<16x128xf32>
    %5 = arith.addf %2, %4 : vector<16x128xf32>
    %cst_5 = arith.constant 0.000000e+00 : f32
    %6 = vector.broadcast %cst_5 : f32 to vector<16x128xf32>
    %7 = arith.maximumf %5, %6 : vector<16x128xf32>
    %8 = arith.truncf %7 : vector<16x128xf32> to vector<16x128xbf16>
    %c0_6 = arith.constant 0 : index
    %c0_7 = arith.constant 0 : index
    %9 = vector.load %arg4[%c0_6, %c0_7] : memref<128x8xbf16, #tpu.memory_space<vmem>>, vector<128x8xbf16>
    %cst_8 = arith.constant dense<0.000000e+00> : vector<16x8xf32>
    %10 = tpu.matmul %8, %9, %cst_8 {dimension_numbers = #tpu.dot_dimension_numbers<[1], [0], [0], [1], [0, 0, 1, 1], [], []>} : vector<16x128xbf16>, vector<128x8xbf16>, vector<16x8xf32> -> vector<16x8xf32>
    %c0_9 = arith.constant 0 : index
    %c0_10 = arith.constant 0 : index
    %11 = vector.load %arg5[%c0_9, %c0_10] : memref<1x8xf32, #tpu.memory_space<vmem>>, vector<1x8xf32>
    %12 = vector.broadcast %11 : vector<1x8xf32> to vector<16x8xf32>
    %13 = arith.addf %10, %12 : vector<16x8xf32>
    %c0_11 = arith.constant 0 : index
    %c0_12 = arith.constant 0 : index
    %14 = vector.load %arg6[%c0_11, %c0_12] : memref<16x8xf32, #tpu.memory_space<vmem>>, vector<16x8xf32>
    tpu.vector_store %arg6[%c0_11, %c0_12], %13 {strides = array<i32>} : memref<16x8xf32, #tpu.memory_space<vmem>>, vector<16x8xf32>,
    return
  }
  func.func @transform_0(%arg0: i32) -> (i32, i32) {
    %c0_i32 = arith.constant 0 : i32
    %c0_i32_0 = arith.constant 0 : i32
    return %arg0, %c0_i32 : i32, i32
  }
  func.func @transform_1(%arg0: i32) -> (i32, i32) {
    %c0_i32 = arith.constant 0 : i32
    %c0_i32_0 = arith.constant 0 : i32
    %c0_i32_1 = arith.constant 0 : i32
    return %c0_i32, %c0_i32_0 : i32, i32
  }
  func.func @transform_2(%arg0: i32) -> (i32, i32) {
    %c0_i32 = arith.constant 0 : i32
    %c0_i32_0 = arith.constant 0 : i32
    %c0_i32_1 = arith.constant 0 : i32
    return %c0_i32, %c0_i32_0 : i32, i32
  }
  func.func @transform_3(%arg0: i32) -> (i32, i32) {
    %c0_i32 = arith.constant 0 : i32
    %c0_i32_0 = arith.constant 0 : i32
    %c0_i32_1 = arith.constant 0 : i32
    return %c0_i32, %c0_i32_0 : i32, i32
  }
  func.func @transform_4(%arg0: i32) -> (i32, i32) {
    %c0_i32 = arith.constant 0 : i32
    %c0_i32_0 = arith.constant 0 : i32
    %c0_i32_1 = arith.constant 0 : i32
    return %c0_i32, %c0_i32_0 : i32, i32
  }
  func.func @transform_5(%arg0: i32) -> (i32, i32) {
    %c0_i32 = arith.constant 0 : i32
    %c0_i32_0 = arith.constant 0 : i32
    return %arg0, %c0_i32 : i32, i32
  }
}

</mosaic_0001>

<bundles_post_ra>
// kernel: tpu_custom_call.1
= control target key start
LH: loop header
LB: loop body
LE: loop exit
PB: predicated region body
PF: predicated region fallthrough
CT: control target
= control target key end

     0   :  { %s533_s18 = smov 0   ;;  %s590_s0 = inlined_call_operand.vmem [shape: bf16[48,32], index: 0, kind: input, shape index: {}]   ;;  %s591_s1 = inlined_call_operand.vmem [shape: bf16[32,128], index: 1, kind: input, shape index: {}]   ;;  %s592_s2 = inlined_call_operand.vmem [shape: f32[1,128], index: 2, kind: input, shape index: {}]   ;;  %s593_s3 = inlined_call_operand.vmem [shape: bf16[128,8], index: 3, kind: input, shape index: {}]   ;;  %s594_s4 = inlined_call_operand.vmem [shape: f32[1,8], index: 4, kind: input, shape index: {}]   ;;  %s595_s5 = inlined_call_operand.vmem [shape: f32[48,8], index: 5, kind: output, shape index: {}]  }
   0x1 LB: > { %s418_s19 = sadd.s32 4294967295, %s501_s18   ;;  %p422_p0 = scmp.ge.s32.totalorder %s501_s18, 1  ;;  %s501_s18 = sphi %s533_s18, %s15_s18  }
   0x2   : > { %p188_p1 = scmp.lt.s32.totalorder %s501_s18, 4 }
   0x4   : > { %p189_p2 = pnand %p422_p0, %p188_p1 }
   0x5   : > { %s423_s22 = sshll.u32 (!%p189_p2), %s418_s19, 1 }
   0x6   : > { %192 = sbr.rel (%p189_p2) target bundleno = 296 (0x128), region = 40  ;;  %p217_p3 = scmp.lt.s32.totalorder (!%p189_p2), %s423_s22, 5 }
   0xb   : > { %v476_v0 = vld [vmem:[%s591_s1 + $0x8] sm:$0xff]  ;;  %v484_v1 = vld [vmem:[%s593_s3 + $0x38] sm:$0xff]  ;;  %v475_v2 = vld [vmem:[%s591_s1] sm:$0xff]  ;;  %s597_s22 = smov (!%p217_p3, %s423_s22), 5  ;;  %vm256_vm0 = vcmask 261120   ;;  %vm359_vm1 = vcmask 64512  }
   0xc   : > { %266 = vmatpush.bf16.msra.mxu0 %v476_v0  ;;  %345 = vmatpush.bf16.msra.mxu1 %v484_v1  ;;  %v483_v3 = vld [vmem:[%s593_s3 + $0x30] sm:$0xff]  ;;  %s424_s29 = sshll.u32 %s597_s22, 2  ;;  %v482_v4 = vld [vmem:[%s593_s3 + $0x28] sm:$0xff]  ;;  %v481_v6 = vld [vmem:[%s593_s3 + $0x20] sm:$0xff]  ;;  %s426_s24 = sshll.u32 %s597_s22, 3 }
   0xd   : > { %s220_s7 = scalar_lea.vmem %s590_s0, %s424_s29  ;;  %v480_v7 = vld [vmem:[%s593_s3 + $0x18] sm:$0xff]  ;;  %v479_v8 = vld [vmem:[%s593_s3 + $0x10] sm:$0xff]  ;;  %v478_v9 = vld [vmem:[%s593_s3 + $0x8] sm:$0xff]  ;;  %s226_s29 = scalar_lea.vmem %s595_s5, %s426_s24 }
   0xe   : > { %v474_v5 = vld [vmem:[%s220_s7] sm:$0xff] }
   0xf   : > { %v477_v10 = vld [vmem:[%s593_s3] sm:$0xff] }
  0x10   : > { %267 = vmatpush.bf16.msra.mxu0 %v475_v2  ;;  %346 = vmatpush.bf16.msra.mxu1 %v483_v3  ;;  %v493_v12 = vld [vmem:[%s592_s2] ss:$0 sm:$0xff] }
  0x11   : > { %v494_v19 = vld [vmem:[%s594_s4] ss:$0 sm:$0xff] }
  0x13   : > { %439 = vmatmul.msk.bf16.vlgmr.msra.gmra.mxu0 %vm256_vm0, %v474_v5 }
  0x14   : > { %347 = vmatpush.bf16.msra.mxu1 %v482_v4 }
  0x18   : > { %348 = vmatpush.bf16.msra.mxu1 %v481_v6 }
  0x1c   : > { %349 = vmatpush.bf16.msra.mxu1 %v480_v7 }
  0x20   : > { %350 = vmatpush.bf16.msra.mxu1 %v479_v8 }
  0x24   : > { %351 = vmatpush.bf16.msra.mxu1 %v478_v9 }
  0x28   : > { %352 = vmatpush.bf16.msra.mxu1 %v477_v10 }
  0x90   : > { %v269_v11 = vpop.f32.mrf.mxu0 }
  0x91   : > { %v270_v13 = vadd.f32 %v493_v12, %v269_v11 }
  0x93   : > { %v274_v16 = vmax.f32 %v270_v13, 0.0 }
  0x98   : > { %v271_v14 = vpop.f32.mrf.mxu0 }
  0x99   : > { %v272_v15 = vadd.f32 %v493_v12, %v271_v14 }
  0x9b   : > { %v275_v17 = vmax.f32 %v272_v15, 0.0 }
  0x9d   : > { %v276_v18 = vpack.c.bf16 %v275_v17, %v274_v16 }
  0x9f   : > { %353 = vmatmul.bf16.vlgmr.msra.gmra.mxu1 %v276_v18 }
 0x11c   : > { %v354_v20 = vpop.f32.mrf.mxu1 }
 0x11d   : > { %v355_v21 = vadd.f32 %v494_v19, %v354_v20 }
 0x11f   : > { %360 = vst.msk [vmem:[%s226_s29] sm:$0xff] %vm359_vm1, %v355_v21 }
 0x124   : > { %v356_v22 = vpop.f32.mrf.mxu1 }
 0x125   : > { %v357_v23 = vadd.f32 %v494_v19, %v356_v22 }
 0x127   : > { %361 = vst.msk [vmem:[%s226_s29 + $0x8] sm:$0xff] %vm359_vm1, %v357_v23 }
 0x128 PF: > { %s15_s18 = sadd.s32 1, %s501_s18  }
 0x129   : > { %p12_p4 = scmp.ge.s32.totalorder %s15_s18, 5  }
 0x12b   :  { %14 = sbr.rel (!%p12_p4) target bundleno = 1 (0x1), region = 70 }

// kernel: tpu_custom_call.1
= control target key start
LH: loop header
LB: loop body
LE: loop exit
PB: predicated region body
PF: predicated region fallthrough
CT: control target
= control target key end

     0   :  { %s533_s18 = smov 0   ;;  %s590_s0 = inlined_call_operand.vmem [shape: bf16[48,32], index: 0, kind: input, shape index: {}]   ;;  %s591_s1 = inlined_call_operand.vmem [shape: bf16[32,128], index: 1, kind: input, shape index: {}]   ;;  %s592_s2 = inlined_call_operand.vmem [shape: f32[1,128], index: 2, kind: input, shape index: {}]   ;;  %s593_s3 = inlined_call_operand.vmem [shape: bf16[128,8], index: 3, kind: input, shape index: {}]   ;;  %s594_s4 = inlined_call_operand.vmem [shape: f32[1,8], index: 4, kind: input, shape index: {}]   ;;  %s595_s5 = inlined_call_operand.vmem [shape: f32[48,8], index: 5, kind: output, shape index: {}]  }
   0x1 LB: > { %s418_s19 = sadd.s32 4294967295, %s501_s18   ;;  %p422_p0 = scmp.ge.s32.totalorder %s501_s18, 1  ;;  %s501_s18 = sphi %s533_s18, %s15_s18  }
   0x2   : > { %p188_p1 = scmp.lt.s32.totalorder %s501_s18, 4 }
   0x4   : > { %p189_p2 = pnand %p422_p0, %p188_p1 }
   0x5   : > { %s423_s22 = sshll.u32 (!%p189_p2), %s418_s19, 1 }
   0x6   : > { %192 = sbr.rel (%p189_p2) target bundleno = 296 (0x128), region = 40  ;;  %p217_p3 = scmp.lt.s32.totalorder (!%p189_p2), %s423_s22, 5 }
   0xb   : > { %v476_v0 = vld [vmem:[%s591_s1 + $0x8] sm:$0xff]  ;;  %v484_v1 = vld [vmem:[%s593_s3 + $0x38] sm:$0xff]  ;;  %v475_v2 = vld [vmem:[%s591_s1] sm:$0xff]  ;;  %s597_s22 = smov (!%p217_p3, %s423_s22), 5  ;;  %vm256_vm0 = vcmask 261120   ;;  %vm359_vm1 = vcmask 64512  }
   0xc   : > { %266 = vmatpush.bf16.msra.mxu0 %v476_v0  ;;  %345 = vmatpush.bf16.msra.mxu1 %v484_v1  ;;  %v483_v3 = vld [vmem:[%s593_s3 + $0x30] sm:$0xff]  ;;  %s424_s29 = sshll.u32 %s597_s22, 2  ;;  %v482_v4 = vld [vmem:[%s593_s3 + $0x28] sm:$0xff]  ;;  %v481_v6 = vld [vmem:[%s593_s3 + $0x20] sm:$0xff]  ;;  %s426_s24 = sshll.u32 %s597_s22, 3 }
   0xd   : > { %s220_s7 = scalar_lea.vmem %s590_s0, %s424_s29  ;;  %v480_v7 = vld [vmem:[%s593_s3 + $0x18] sm:$0xff]  ;;  %v479_v8 = vld [vmem:[%s593_s3 + $0x10] sm:$0xff]  ;;  %v478_v9 = vld [vmem:[%s593_s3 + $0x8] sm:$0xff]  ;;  %s226_s29 = scalar_lea.vmem %s595_s5, %s426_s24 }
   0xe   : > { %v474_v5 = vld [vmem:[%s220_s7] sm:$0xff] }
   0xf   : > { %v477_v10 = vld [vmem:[%s593_s3] sm:$0xff] }
  0x10   : > { %267 = vmatpush.bf16.msra.mxu0 %v475_v2  ;;  %346 = vmatpush.bf16.msra.mxu1 %v483_v3  ;;  %v493_v12 = vld [vmem:[%s592_s2] ss:$0 sm:$0xff] }
  0x11   : > { %v494_v19 = vld [vmem:[%s594_s4] ss:$0 sm:$0xff] }
  0x13   : > { %439 = vmatmul.msk.bf16.vlgmr.msra.gmra.mxu0 %vm256_vm0, %v474_v5 }
  0x14   : > { %347 = vmatpush.bf16.msra.mxu1 %v482_v4 }
  0x18   : > { %348 = vmatpush.bf16.msra.mxu1 %v481_v6 }
  0x1c   : > { %349 = vmatpush.bf16.msra.mxu1 %v480_v7 }
  0x20   : > { %350 = vmatpush.bf16.msra.mxu1 %v479_v8 }
  0x24   : > { %351 = vmatpush.bf16.msra.mxu1 %v478_v9 }
  0x28   : > { %352 = vmatpush.bf16.msra.mxu1 %v477_v10 }
  0x90   : > { %v269_v11 = vpop.f32.mrf.mxu0 }
  0x91   : > { %v270_v13 = vadd.f32 %v493_v12, %v269_v11 }
  0x93   : > { %v274_v16 = vmax.f32 %v270_v13, 0.0 }
  0x98   : > { %v271_v14 = vpop.f32.mrf.mxu0 }
  0x99   : > { %v272_v15 = vadd.f32 %v493_v12, %v271_v14 }
  0x9b   : > { %v275_v17 = vmax.f32 %v272_v15, 0.0 }
  0x9d   : > { %v276_v18 = vpack.c.bf16 %v275_v17, %v274_v16 }
  0x9f   : > { %353 = vmatmul.bf16.vlgmr.msra.gmra.mxu1 %v276_v18 }
 0x11c   : > { %v354_v20 = vpop.f32.mrf.mxu1 }
 0x11d   : > { %v355_v21 = vadd.f32 %v494_v19, %v354_v20 }
 0x11f   : > { %360 = vst.msk [vmem:[%s226_s29] sm:$0xff] %vm359_vm1, %v355_v21 }
 0x124   : > { %v356_v22 = vpop.f32.mrf.mxu1 }
 0x125   : > { %v357_v23 = vadd.f32 %v494_v19, %v356_v22 }
 0x127   : > { %361 = vst.msk [vmem:[%s226_s29 + $0x8] sm:$0xff] %vm359_vm1, %v357_v23 }
 0x128 PF: > { %s15_s18 = sadd.s32 1, %s501_s18  }
 0x129   : > { %p12_p4 = scmp.ge.s32.totalorder %s15_s18, 5  }
 0x12b   :  { %14 = sbr.rel (!%p12_p4) target bundleno = 1 (0x1), region = 70 }

</bundles_post_ra>
